<compile_context>
chip_gen: v7x
topology: tpu7x:2x2x1
jax: 0.10.0
libtpu: 0.0.40
codegen_flags: <defaults>
</compile_context>

<pallas_src>
import functools

import jax
import jax.numpy as jnp
import numpy as np
from jax.experimental import pallas as pl
from jax.experimental.pallas import tpu as pltpu

_LANES = 128
_SUBLANES = 8
_CHUNK_ROWS = 512          # inner elementwise chunk (multiple of 8)


def _num_tensorcores() -> int:
    """1 on single-TC chips (v5e/v6e); 2 on v7x (two TensorCores per chip)."""
    try:
        kind = jax.devices()[0].device_kind.lower()
    except Exception:  # pragma: no cover - defensive
        return 1
    return 2 if "v7" in kind else 1


def _seg_loss_kernel(x_ref, y_ref, out_ref, *, tile_rows, chunk_rows, rows,
                     blocks_per_shard, mask_needed):
    """Accumulates lane-wise partial sums into the resident (1, 4, 128) output:
         row 0: sum(pred * label)   (dice intersection)
         row 1: sum(pred)
         row 2: sum(label)
         row 3: sum(per-element BCE terms)
    """
    s = pl.program_id(0)   # shard (TensorCore) axis
    i = pl.program_id(1)   # arbitrary reduction axis

    @pl.when(i == 0)
    def _():
        out_ref[...] = jnp.zeros_like(out_ref)

    n_chunks = tile_rows // chunk_rows
    blk = s * blocks_per_shard + i          # logical block index (may be past the end)
    tile_start = blk * tile_rows

    def chunk_sums(xc, yc, valid):
        x = xc.astype(jnp.float32)
        y = yc.astype(jnp.float32)
        pred = jax.nn.sigmoid(x)
        lm = jnp.log1p(-pred)                               # log(1 - pred); -inf if pred==1
        log_1mp = jnp.maximum(lm, -100.0)                   # BCELoss clamp
        # log(pred) == x + log(1 - pred); exactly 0 when pred rounds to 1.0
        log_p = jnp.maximum(jnp.where(pred < 1.0, x + lm, 0.0), -100.0)
        bce = -(y * log_p + (1.0 - y) * log_1mp)
        if valid is not None:
            # Invalid rows may hold garbage (possibly NaN/Inf): select, don't multiply.
            pred = jnp.where(valid, pred, 0.0)
            y = jnp.where(valid, y, 0.0)
            bce = jnp.where(valid, bce, 0.0)
        return jnp.stack(
            [jnp.sum(pred * y, axis=0),
             jnp.sum(pred, axis=0),
             jnp.sum(y, axis=0),
             jnp.sum(bce, axis=0)], axis=0)                  # (4, 128)

    def one_chunk(off, masked):
        xc = x_ref[pl.ds(off, chunk_rows), :]
        yc = y_ref[pl.ds(off, chunk_rows), :]
        if masked:
            row_ids = jax.lax.broadcasted_iota(jnp.int32, (chunk_rows, _LANES), 0)
            valid = (tile_start + off + row_ids) < rows
        else:
            valid = None
        return chunk_sums(xc, yc, valid)

    def tile_acc(masked):
        if n_chunks == 1:
            return one_chunk(0, masked)

        def body(c, acc):
            off = pl.multiple_of(c * chunk_rows, chunk_rows)
            return acc + one_chunk(off, masked)

        return jax.lax.fori_loop(0, n_chunks, body,
                                 jnp.zeros((4, _LANES), jnp.float32))

    if mask_needed:
        n_valid = rows - blk * tile_rows

        @pl.when(n_valid >= tile_rows)      # full tile: no mask work at all
        def _():
            out_ref[...] += tile_acc(False)[None, :, :]

        @pl.when(n_valid < tile_rows)       # ragged / duplicated tile (rare)
        def _():
            out_ref[...] += tile_acc(True)[None, :, :]
    else:
        out_ref[...] += tile_acc(False)[None, :, :]


@functools.partial(jax.jit, static_argnames=("max_tile_rows",))
def seg_loss(logit_pred, label, max_tile_rows=8192):
    """Equivalent of Seg_loss.forward(logit_pred, label) -> scalar.

    Callers may pass bf16 logits/labels; the kernel upcasts to f32 internally,
    which halves HBM traffic on bandwidth-bound chips.
    """
    n_total = logit_pred.size

    x = logit_pred.reshape(-1)
    y = label.reshape(-1)

    rows = n_total // _LANES
    sums = jnp.zeros((4,), jnp.float32)
    main = 0

    if rows >= _SUBLANES:
        main = rows * _LANES

        # Tile: as big as allowed, multiple of the inner chunk, never > rows
        # (so every block starts in-bounds).
        rows_aligned = (rows // _SUBLANES) * _SUBLANES
        tile = max(_SUBLANES, min(int(max_tile_rows), rows_aligned))
        chunk = min(_CHUNK_ROWS, tile)
        tile = (tile // chunk) * chunk

        blocks_total = pl.cdiv(rows, tile)
        num_shards = _num_tensorcores() if blocks_total >= 2 else 1
        bps = pl.cdiv(blocks_total, num_shards)
        mask_needed = (num_shards * bps * tile) != rows
        # Invariant: any duplicated (fully out-of-range) block introduced by the
        # clamped index_map below MUST be zeroed by the in-kernel mask.
        assert mask_needed or (num_shards * bps == blocks_total)

        if num_shards * bps > blocks_total:
            # Extra (fully-invalid) blocks re-read the last real block; their
            # contribution is zeroed by the in-kernel mask (see assert above).
            def in_map(s, i):
                return (jnp.minimum(s * bps + i, blocks_total - 1), 0)
        else:
            def in_map(s, i):
                return (s * bps + i, 0)

        xm = x[:main].reshape(rows, _LANES)
        ym = y[:main].reshape(rows, _LANES)

        kernel = functools.partial(
            _seg_loss_kernel, tile_rows=tile, chunk_rows=chunk, rows=rows,
            blocks_per_shard=bps, mask_needed=mask_needed)

        # 2 pipeline buffers per input stream + headroom for in-kernel temps;
        # keeps big tiles legal on v5e's 16 MiB default scoped VMEM and safely
        # under v7x's 64 MiB physical VMEM.
        stream_bytes = 2 * tile * _LANES * (xm.dtype.itemsize + ym.dtype.itemsize)
        vmem_limit = int(min(max(stream_bytes + (8 << 20), 16 << 20), 48 << 20))

        # TODO(synk): on v7x, verify in the trace that the leading "parallel"
        # axis actually splits across the two TensorCores; if not, switch it to
        # pltpu.CORE_PARALLEL.
        partial = pl.pallas_call(
            kernel,
            out_shape=jax.ShapeDtypeStruct((num_shards, 4, _LANES), jnp.float32),
            grid_spec=pltpu.PrefetchScalarGridSpec(
                num_scalar_prefetch=0,
                grid=(num_shards, bps),
                in_specs=[pl.BlockSpec((tile, _LANES), in_map),
                          pl.BlockSpec((tile, _LANES), in_map)],
                out_specs=pl.BlockSpec((1, 4, _LANES), lambda s, i: (s, 0, 0)),
            ),
            compiler_params=pltpu.CompilerParams(
                dimension_semantics=("parallel", "arbitrary"),
                vmem_limit_bytes=vmem_limit),
        )(xm, ym)

        sums = sums + jnp.sum(partial, axis=(0, 2))

    # <128-element tail handled in plain JAX glue (tiny), same math as in-kernel.
    if main < n_total:
        xt = x[main:].astype(jnp.float32)
        yt = y[main:].astype(jnp.float32)
        pt = jax.nn.sigmoid(xt)
        lmt = jnp.log1p(-pt)
        log_p_t = jnp.maximum(jnp.where(pt < 1.0, xt + lmt, 0.0), -100.0)
        log_1mp_t = jnp.maximum(lmt, -100.0)
        bce_t = -(yt * log_p_t + (1.0 - yt) * log_1mp_t)
        sums = sums + jnp.stack(
            [jnp.sum(pt * yt), jnp.sum(pt), jnp.sum(yt), jnp.sum(bce_t)])

    intersection, pred_sum, label_sum, bce_sum = sums[0], sums[1], sums[2], sums[3]
    smooth = 1.0
    dice = 1.0 - (2.0 * intersection + smooth) / (pred_sum + label_sum + smooth)
    bce = bce_sum / n_total
    return dice + bce


def _seg_loss_reference(logit_pred, label):
    """Pure-JAX reference mirroring the PyTorch module."""
    pred = jax.nn.sigmoid(logit_pred.astype(jnp.float32))
    y = label.astype(jnp.float32)
    smooth = 1.0
    intersection = jnp.sum(pred * y)
    dice = 1.0 - (2.0 * intersection + smooth) / (jnp.sum(pred) + jnp.sum(y) + smooth)
    log_p = jnp.maximum(jnp.log(pred), -100.0)
    log_1mp = jnp.maximum(jnp.log1p(-pred), -100.0)
    bce = jnp.mean(-(y * log_p + (1.0 - y) * log_1mp))
    return dice + bce


if __name__ == "__main__":
    key = jax.random.PRNGKey(0)
    k1, k2, k3, k4, k5, k6 = jax.random.split(key, 6)

    # Primary shape consistent with a segmentation loss: (B, C, H, W) = (2, 4, 16, 16)
    logit_pred = jax.random.normal(k1, (2, 4, 16, 16), dtype=jnp.float32)
    label = jax.random.bernoulli(k2, p=0.3, shape=(2, 4, 16, 16)).astype(jnp.float32)

    out = jax.block_until_ready(seg_loss(logit_pred, label))
    ref = jax.block_until_ready(_seg_loss_reference(logit_pred, label))
    np.testing.assert_allclose(np.asarray(out), np.asarray(ref), rtol=1e-5, atol=1e-5)

    # Ragged shape exercising the pl.when fast/masked split and the <128-elem
    # JAX tail: 3*1*36*40 = 4320 elements -> 33 lane-rows, 2 blocks of 32.
    logit2 = jax.random.normal(k3, (3, 1, 36, 40), dtype=jnp.float32)
    label2 = jax.random.bernoulli(k4, p=0.5, shape=(3, 1, 36, 40)).astype(jnp.float32)

    out2 = jax.block_until_ready(seg_loss(logit2, label2))
    ref2 = jax.block_until_ready(_seg_loss_reference(logit2, label2))
    np.testing.assert_allclose(np.asarray(out2), np.asarray(ref2), rtol=1e-5, atol=1e-5)

    # Shape exercising the chunked inner fori_loop (tile 1024 rows, 2 chunks)
    # plus a ragged second block: 2*1*256*260 = 133120 elements -> 1040 rows.
    logit3 = jax.random.normal(k5, (2, 1, 256, 260), dtype=jnp.float32)
    label3 = jax.random.bernoulli(k6, p=0.4, shape=(2, 1, 256, 260)).astype(jnp.float32)

    out3 = jax.block_until_ready(seg_loss(logit3, label3))
    ref3 = jax.block_until_ready(_seg_loss_reference(logit3, label3))
    np.testing.assert_allclose(np.asarray(out3), np.asarray(ref3), rtol=1e-5, atol=1e-5)

    print("KERNEL_OK")
</pallas_src>

<mosaic_0001>
module attributes {stable_mosaic.version = 11 : i64} {
  func.func @_seg_loss_kernel(%arg0: i32, %arg1: i32, %arg2: memref<16x128xf32, #tpu.memory_space<vmem>>, %arg3: memref<16x128xf32, #tpu.memory_space<vmem>>, %arg4: memref<1x4x128xf32, #tpu.memory_space<vmem>>) attributes {dimension_semantics = [#tpu.dimension_semantics<parallel>, #tpu.dimension_semantics<arbitrary>], iteration_bounds = array<i64: 1, 1>, scalar_prefetch = 0 : i64, scratch_operands = 0 : i64, tpu.core_type = #tpu.core_type<tc>, window_params = [{transform_indices = @transform_0, window_bounds = array<i64: 16, 128>}, {transform_indices = @transform_1, window_bounds = array<i64: 16, 128>}, {transform_indices = @transform_2, window_bounds = array<i64: 1, 4, 128>}]} {
    %c0_i32 = arith.constant 0 : i32
    %0 = arith.cmpi eq, %arg1, %c0_i32 : i32
    %1 = arith.extui %0 : i1 to i32
    %c0_i32_0 = arith.constant 0 : i32
    %2 = arith.cmpi ne, %1, %c0_i32_0 : i32
    scf.if %2 {
      %cst_21 = arith.constant 0.000000e+00 : f32
      %43 = vector.broadcast %cst_21 : f32 to vector<1x4x128xf32>
      %c0_22 = arith.constant 0 : index
      %c0_23 = arith.constant 0 : index
      %c0_24 = arith.constant 0 : index
      %44 = vector.load %arg4[%c0_22, %c0_23, %c0_24] : memref<1x4x128xf32, #tpu.memory_space<vmem>>, vector<1x4x128xf32>
      tpu.vector_store %arg4[%c0_22, %c0_23, %c0_24], %43 {strides = array<i32>} : memref<1x4x128xf32, #tpu.memory_space<vmem>>, vector<1x4x128xf32>,
    } else {
    }
    %c0 = arith.constant 0 : index
    %c0_1 = arith.constant 0 : index
    %c0_2 = arith.constant 0 : index
    %3 = vector.load %arg4[%c0, %c0_1, %c0_2] : memref<1x4x128xf32, #tpu.memory_space<vmem>>, vector<1x4x128xf32>
    %c0_3 = arith.constant 0 : index
    %c0_4 = arith.constant 0 : index
    %4 = vector.load %arg2[%c0_3, %c0_4] : memref<16x128xf32, #tpu.memory_space<vmem>>, vector<16x128xf32>
    %c0_5 = arith.constant 0 : index
    %c0_6 = arith.constant 0 : index
    %5 = vector.load %arg3[%c0_5, %c0_6] : memref<16x128xf32, #tpu.memory_space<vmem>>, vector<16x128xf32>
    %6 = arith.negf %4 : vector<16x128xf32>
    %7 = math.exp %6 : vector<16x128xf32>
    %cst = arith.constant 1.000000e+00 : f32
    %8 = vector.broadcast %cst : f32 to vector<16x128xf32>
    %9 = arith.addf %8, %7 : vector<16x128xf32>
    %10 = arith.divf %8, %9 : vector<16x128xf32>
    %cst_7 = arith.constant 0.000000e+00 : f32
    %11 = vector.broadcast %cst_7 : f32 to vector<16x128xf32>
    %12 = arith.subf %11, %10 : vector<16x128xf32>
    %13 = math.log1p %12 : vector<16x128xf32>
    %cst_8 = arith.constant -1.000000e+02 : f32
    %14 = vector.broadcast %cst_8 : f32 to vector<16x128xf32>
    %15 = arith.maximumf %13, %14 : vector<16x128xf32>
    %cst_9 = arith.constant 1.000000e+00 : f32
    %16 = vector.broadcast %cst_9 : f32 to vector<16x128xf32>
    %17 = arith.cmpf olt, %10, %16 : vector<16x128xf32>
    %18 = arith.addf %4, %13 : vector<16x128xf32>
    %cst_10 = arith.constant 0.000000e+00 : f32
    %19 = vector.broadcast %cst_10 : f32 to vector<16x128xf32>
    %20 = arith.select %17, %18, %19 : vector<16x128xi1>, vector<16x128xf32>
    %cst_11 = arith.constant -1.000000e+02 : f32
    %21 = vector.broadcast %cst_11 : f32 to vector<16x128xf32>
    %22 = arith.maximumf %20, %21 : vector<16x128xf32>
    %23 = arith.mulf %5, %22 : vector<16x128xf32>
    %cst_12 = arith.constant 1.000000e+00 : f32
    %24 = vector.broadcast %cst_12 : f32 to vector<16x128xf32>
    %25 = arith.subf %24, %5 : vector<16x128xf32>
    %26 = arith.mulf %25, %15 : vector<16x128xf32>
    %27 = arith.addf %23, %26 : vector<16x128xf32>
    %cst_13 = arith.constant 0.000000e+00 : f32
    %28 = vector.broadcast %cst_13 : f32 to vector<16x128xf32>
    %29 = arith.subf %28, %27 : vector<16x128xf32>
    %30 = arith.mulf %10, %5 : vector<16x128xf32>
    %cst_14 = arith.constant dense<0.000000e+00> : vector<128xf32>
    %31 = vector.multi_reduction <add>, %30, %cst_14 [0] : vector<16x128xf32> to vector<128xf32>
    %cst_15 = arith.constant dense<0.000000e+00> : vector<128xf32>
    %32 = vector.multi_reduction <add>, %10, %cst_15 [0] : vector<16x128xf32> to vector<128xf32>
    %cst_16 = arith.constant dense<0.000000e+00> : vector<128xf32>
    %33 = vector.multi_reduction <add>, %5, %cst_16 [0] : vector<16x128xf32> to vector<128xf32>
    %cst_17 = arith.constant dense<0.000000e+00> : vector<128xf32>
    %34 = vector.multi_reduction <add>, %29, %cst_17 [0] : vector<16x128xf32> to vector<128xf32>
    %35 = vector.shape_cast %31 : vector<128xf32> to vector<1x128xf32>
    %36 = vector.shape_cast %32 : vector<128xf32> to vector<1x128xf32>
    %37 = vector.shape_cast %33 : vector<128xf32> to vector<1x128xf32>
    %38 = vector.shape_cast %34 : vector<128xf32> to vector<1x128xf32>
    %39 = tpu.concatenate %35, %36, %37, %38 in 0 : vector<1x128xf32>, vector<1x128xf32>, vector<1x128xf32>, vector<1x128xf32> -> vector<4x128xf32>
    %40 = vector.shape_cast %39 : vector<4x128xf32> to vector<1x4x128xf32>
    %41 = arith.addf %3, %40 : vector<1x4x128xf32>
    %c0_18 = arith.constant 0 : index
    %c0_19 = arith.constant 0 : index
    %c0_20 = arith.constant 0 : index
    %42 = vector.load %arg4[%c0_18, %c0_19, %c0_20] : memref<1x4x128xf32, #tpu.memory_space<vmem>>, vector<1x4x128xf32>
    tpu.vector_store %arg4[%c0_18, %c0_19, %c0_20], %41 {strides = array<i32>} : memref<1x4x128xf32, #tpu.memory_space<vmem>>, vector<1x4x128xf32>,
    return
  }
  func.func @transform_0(%arg0: i32, %arg1: i32) -> (i32, i32) {
    %c1_i32 = arith.constant 1 : i32
    %0 = arith.muli %arg0, %c1_i32 : i32
    %1 = arith.addi %0, %arg1 : i32
    %c0_i32 = arith.constant 0 : i32
    %c0_i32_0 = arith.constant 0 : i32
    return %1, %c0_i32 : i32, i32
  }
  func.func @transform_1(%arg0: i32, %arg1: i32) -> (i32, i32) {
    %c1_i32 = arith.constant 1 : i32
    %0 = arith.muli %arg0, %c1_i32 : i32
    %1 = arith.addi %0, %arg1 : i32
    %c0_i32 = arith.constant 0 : i32
    %c0_i32_0 = arith.constant 0 : i32
    return %1, %c0_i32 : i32, i32
  }
  func.func @transform_2(%arg0: i32, %arg1: i32) -> (i32, i32, i32) {
    %c0_i32 = arith.constant 0 : i32
    %c0_i32_0 = arith.constant 0 : i32
    %c0_i32_1 = arith.constant 0 : i32
    return %arg0, %c0_i32, %c0_i32_0 : i32, i32, i32
  }
}

</mosaic_0001>

<bundles_post_ra>
// kernel: seg_loss.1
= control target key start
LH: loop header
LB: loop body
LE: loop exit
PB: predicated region body
PF: predicated region fallthrough
CT: control target
= control target key end

     0   :  { %v186_v0 = vmov 0.0   ;;  %vm147_vm4 = vcmask 1040384   ;;  %vm149_vm5 = vcmask 1041408   ;;  %vm151_vm6 = vcmask 1042432   ;;  %s223_s2 = inlined_call_operand.vmem [shape: f32[1,4,128], index: 2, kind: output, shape index: {}]   ;;  %s224_s0 = inlined_call_operand.vmem [shape: f32[16,128], index: 0, kind: input, shape index: {}]   ;;  %s225_s1 = inlined_call_operand.vmem [shape: f32[16,128], index: 1, kind: input, shape index: {}]  }
   0x1   :  { %59 = vst [vmem:[%s223_s2] sm:$0xf] %v186_v0  ;;  %v61_v1 = vld [vmem:[%s224_s0] sm:$0xff]  ;;  %v62_v2 = vld [vmem:[%s224_s0 + $0x8] sm:$0xff] }
   0x2   :  { %v171_v3 = vmul.f32 -1.442695, %v61_v1  ;;  %v172_v4 = vmul.f32 -1.442695, %v62_v2  ;;  %v63_v15 = vld [vmem:[%s225_s1] sm:$0xff]  ;;  %v64_v16 = vld [vmem:[%s225_s1 + $0x8] sm:$0xff] }
   0x3   :  { %v133_v27 = vadd.f32 %v64_v16, %v63_v15  ;;  %v109_v36 = vsub.f32 1.0, %v63_v15  ;;  %v110_v37 = vsub.f32 1.0, %v64_v16 }
   0x4   :  { %174 = vpow2.f32 %v171_v3 }
   0x5   :  { %176 = vpow2.f32 %v172_v4  ;;  %v134_v38 = vrot.slane %v133_v27, 4 }
   0x7   :  { %v135_v51 = vadd.f32 %v134_v38, %v133_v27 }
   0x9   :  { %v136_v59 = vrot.slane %v135_v51, 2 }
   0xe   :  { %v175_v5 = vpop.eup %174 }
   0xf   :  { %v177_v6 = vpop.eup %176  ;;  %v71_v7 = vadd.f32 1.0, %v175_v5 }
  0x10   :  { %v72_v8 = vadd.f32 1.0, %v177_v6 }
  0x11   :  { %178 = vrcp.f32 %v71_v7 }
  0x12   :  { %180 = vrcp.f32 %v72_v8 }
  0x1b   :  { %v179_v9 = vpop.eup %178 }
  0x1c   :  { %v181_v10 = vpop.eup %180  ;;  %v77_v11 = vsub.f32 0.0, %v179_v9  ;;  %v117_v19 = vmul.f32 %v179_v9, %v63_v15  ;;  %vm99_vm2 = vcmp.lt.f32.partialorder %v179_v9, 1.0 }
  0x1d   :  { %v78_v12 = vsub.f32 0.0, %v181_v10  ;;  %v118_v20 = vmul.f32 %v181_v10, %v64_v16  ;;  %v126_v22 = vadd.f32 %v181_v10, %v179_v9  ;;  %vm100_vm3 = vcmp.lt.f32.partialorder %v181_v10, 1.0 }
  0x1e   :  { %v79_v13 = vadd.f32 1.0, %v77_v11  ;;  %v82_v17 = vmul.f32 -0.5, %v77_v11  ;;  %v85_v23 = vand.u32 2147483647, %v77_v11 }
  0x1f   :  { %v88_v14 = vadd.f32 1.0, %v78_v12  ;;  %v91_v18 = vmul.f32 -0.5, %v78_v12  ;;  %v119_v25 = vadd.f32 %v118_v20, %v117_v19  ;;  %v94_v26 = vand.u32 2147483647, %v78_v12 }
  0x20   :  { %182 = vlog2.f32 %v79_v13  ;;  %v83_v21 = vadd.f32 1.0, %v82_v17  ;;  %v127_v29 = vrot.slane %v126_v22, 4  ;;  %vm86_vm0 = vcmp.lt.f32.partialorder %v85_v23, 0.0004427343 }
  0x21   :  { %184 = vlog2.f32 %v88_v14  ;;  %v92_v24 = vadd.f32 1.0, %v91_v18  ;;  %v120_v32 = vrot.slane %v119_v25, 4  ;;  %vm95_vm1 = vcmp.lt.f32.partialorder %v94_v26, 0.0004427343 }
  0x22   :  { %v84_v28 = vmul.f32 %v83_v21, %v77_v11  ;;  %v128_v40 = vadd.f32 %v127_v29, %v126_v22 }
  0x23   :  { %v93_v31 = vmul.f32 %v92_v24, %v78_v12  ;;  %v121_v44 = vadd.f32 %v120_v32, %v119_v25 }
  0x24   :  { %v129_v55 = vrot.slane %v128_v40, 2 }
  0x25   :  { %v122_v54 = vrot.slane %v121_v44, 2 }
  0x26   :  { %v130_v62 = vadd.f32 %v129_v55, %v128_v40 }
  0x27   :  { %v123_v61 = vadd.f32 %v122_v54, %v121_v44 }
  0x28   :  { %v131_v3 = vrot.slane %v130_v62, 1 }
  0x2a   :  { %v183_v30 = vpop.eup %182  ;;  %v132_v8 = vadd.f32 %v131_v3, %v130_v62 }
  0x2b   :  { %v185_v33 = vpop.eup %184  ;;  %v81_v34 = vmul.f32 0.6931472, %v183_v30 }
  0x2c   :  { %v90_v35 = vmul.f32 0.6931472, %v185_v33 }
  0x2d   :  { %v87_v39 = vsel %vm86_vm0, %v84_v28, %v81_v34 }
  0x2e   :  { %v96_v41 = vsel %vm95_vm1, %v93_v31, %v90_v35  ;;  %v97_v42 = vmax.f32 %v87_v39, -100.0  ;;  %v101_v43 = vadd.f32 %v87_v39, %v61_v1  ;;  %v137_v1 = vadd.f32 %v136_v59, %v135_v51 }
  0x2f   :  { %v98_v45 = vmax.f32 %v96_v41, -100.0  ;;  %v102_v46 = vadd.f32 %v96_v41, %v62_v2  ;;  %v124_v2 = vrot.slane %v123_v61, 1 }
  0x30   :  { %v103_v47 = vsel %vm99_vm2, %v101_v43, 0.0  ;;  %v111_v50 = vmul.f32 %v109_v36, %v97_v42  ;;  %v138_v6 = vrot.slane %v137_v1, 1 }
  0x31   :  { %v104_v48 = vsel %vm100_vm3, %v102_v46, 0.0  ;;  %v105_v49 = vmax.f32 %v103_v47, -100.0  ;;  %v112_v53 = vmul.f32 %v110_v37, %v98_v45  ;;  %v125_v7 = vadd.f32 %v124_v2, %v123_v61 }
  0x32   :  { %v106_v52 = vmax.f32 %v104_v48, -100.0  ;;  %v139_v11 = vadd.f32 %v138_v6, %v137_v1 }
  0x33   :  { %v107_v56 = vmul.f32 %v105_v49, %v63_v15  ;;  %v148_v13 = vsel %vm147_vm4, %v125_v7, %v132_v8 }
  0x34   :  { %v108_v57 = vmul.f32 %v106_v52, %v64_v16  ;;  %v150_v15 = vsel %vm149_vm5, %v148_v13, %v139_v11  ;;  %v60_v16 = vld [vmem:[%s223_s2] sm:$0xf] }
  0x35   :  { %v113_v58 = vadd.f32 %v111_v50, %v107_v56 }
  0x36   :  { %v114_v60 = vadd.f32 %v112_v53, %v108_v57 }
  0x37   :  { %v115_v63 = vsub.f32 0.0, %v113_v58 }
  0x38   :  { %v116_v0 = vsub.f32 0.0, %v114_v60 }
  0x3a   :  { %v140_v4 = vadd.f32 %v116_v0, %v115_v63 }
  0x3c   :  { %v141_v5 = vrot.slane %v140_v4, 4 }
  0x3e   :  { %v142_v9 = vadd.f32 %v141_v5, %v140_v4 }
  0x40   :  { %v143_v10 = vrot.slane %v142_v9, 2 }
  0x42   :  { %v144_v12 = vadd.f32 %v143_v10, %v142_v9 }
  0x44   :  { %v145_v14 = vrot.slane %v144_v12, 1 }
  0x46   :  { %v146_v17 = vadd.f32 %v145_v14, %v144_v12 }
  0x48   :  { %v152_v18 = vsel %vm151_vm6, %v150_v15, %v146_v17 }
  0x49   :  { %v153_v19 = vadd.f32 %v152_v18, %v60_v16 }
  0x4b   :  { %154 = vst [vmem:[%s223_s2] sm:$0xf] %v153_v19 }

</bundles_post_ra>
